<compile_context>
chip_gen: v6e
topology: v6e:2x2x1
jax: 0.10.0
libtpu: 0.0.40
codegen_flags: <defaults>
</compile_context>

<pallas_src>
import math

import jax
import jax.numpy as jnp
from jax.experimental import pallas as pl
from jax.experimental.pallas import tpu as pltpu


# ---------------------------------------------------------------------------
# pe buffer construction (host-side, mirrors the PyTorch __init__).
# Build it once, already in the dtype the activations will use.
# ---------------------------------------------------------------------------
def _build_pe(d_model: int, max_len: int = 1000, dtype=jnp.float32) -> jnp.ndarray:
    """Sinusoidal positional-encoding table, shape (max_len, 1, d_model)."""
    position = jnp.arange(0, max_len, dtype=jnp.float32)[:, None]          # (max_len, 1)
    div_term = jnp.exp(
        jnp.arange(0, d_model, 2, dtype=jnp.float32)
        * (-math.log(10000.0) / d_model)
    )
    pe = jnp.zeros((max_len, d_model), dtype=jnp.float32)
    pe = pe.at[:, 0::2].set(jnp.sin(position * div_term))
    if d_model > 1:
        # Guard for odd d_model: the cos columns only number d_model // 2.
        pe = pe.at[:, 1::2].set(jnp.cos(position * div_term[: d_model // 2]))
    return pe[:, None, :].astype(dtype)                                     # (max_len, 1, d_model)


# ---------------------------------------------------------------------------
# Kernel: elementwise add, broadcasting pe over the batch axis (VPU hot path).
# Works for both the 3-D (TILE_S, TILE_B, D)+(TILE_S, 1, D) layout and the
# 2-D (TILE_S, D)+(TILE_S, D) layout.
# ---------------------------------------------------------------------------
def _pe_add_kernel(x_ref, pe_ref, o_ref):
    o_ref[...] = x_ref[...] + pe_ref[...]


# ---------------------------------------------------------------------------
# Tile sizing (layout-aware VMEM accounting).
# ---------------------------------------------------------------------------
_SUBLANE_GRANULE = {1: 32, 2: 16, 4: 8, 8: 8}   # itemsize -> sublane rows per vreg
_LANE_GRANULE = 128
_MIN_SEQ_STEPS = 4                               # pipeline depth / megacore split target
_SMALL_TENSOR_BYTES = 4 * 1024 * 1024            # below this a (1,1) grid is fine


def _round_up(x: int, m: int) -> int:
    return ((x + m - 1) // m) * m


_VMEM_SIZES = None


def _vmem_budget():
    """(vmem_limit_bytes, working_set_budget_bytes) derived from the chip."""
    global _VMEM_SIZES
    if _VMEM_SIZES is None:
        try:
            cap = int(pltpu.get_tpu_info().vmem_capacity_bytes)
        except Exception:
            cap = 64 * 1024 * 1024          # conservative (v7x-sized) fallback
        if cap >= 100 * 1024 * 1024:        # v5e / v6e: 128 MiB physical
            _VMEM_SIZES = (64 * 1024 * 1024, 48 * 1024 * 1024)
        else:                               # v7x: 64 MiB physical
            _VMEM_SIZES = (32 * 1024 * 1024, 20 * 1024 * 1024)
    return _VMEM_SIZES


def _choose_tiles_3d(seq_len, batch, d_model, itemsize, budget):
    """Largest (tile_s, tile_b) whose *padded*, double-buffered working set fits."""
    gran = _SUBLANE_GRANULE.get(itemsize, 8)
    d_pad = _round_up(d_model, _LANE_GRANULE)

    def step_bytes(ts, tb):
        tb_pad = _round_up(tb, gran)
        # x tile + out tile: (ts, tb_pad, d_pad); pe tile: (ts, gran, d_pad);
        # each double-buffered by the pipeline.
        return 2 * itemsize * ts * d_pad * (2 * tb_pad + gran)

    tile_b = batch
    if step_bytes(1, tile_b) > budget:
        # A single seq row is already too big: tile the batch (sublane) dim too.
        max_tb_pad = max(gran, (budget // (2 * itemsize * d_pad) - gran) // 2)
        tile_b = max(gran, (max_tb_pad // gran) * gran)
        tile_b = min(tile_b, batch)
        # TODO(synk): if d_model alone ever exceeds the budget, d_model would
        # also need tiling; not needed for realistic transformer widths.

    tile_s = max(1, budget // step_bytes(1, tile_b))
    if tile_s >= 8:
        tile_s = (tile_s // 8) * 8
    tile_s = min(tile_s, seq_len)
    return int(tile_s), int(tile_b)


def _choose_tile_2d(seq_len, d_model, itemsize, budget):
    """Seq tile for the batch==1 layout (seq rows on the sublane axis)."""
    gran = _SUBLANE_GRANULE.get(itemsize, 8)
    d_pad = _round_up(d_model, _LANE_GRANULE)
    per_row = 2 * 3 * itemsize * d_pad          # x + out + pe rows, double-buffered
    tile_s = max(gran, (budget // per_row // gran) * gran)
    if tile_s >= seq_len:
        tile_s = seq_len                         # full dim -> exempt from /8 rule
    return int(tile_s)


def _cap_for_pipeline(tile_s, seq_len, total_bytes, granule):
    """Ensure >= _MIN_SEQ_STEPS seq-grid steps for non-trivial tensors."""
    if total_bytes <= _SMALL_TENSOR_BYTES:
        return tile_s
    cap = _round_up(max(granule, -(-seq_len // _MIN_SEQ_STEPS)), granule)
    return max(1, min(tile_s, cap))


# ---------------------------------------------------------------------------
# Wrapper.
# ---------------------------------------------------------------------------
def positional_encoding_forward(x: jnp.ndarray, pe: jnp.ndarray) -> jnp.ndarray:
    """x: (seq_len, batch, d_model); pe: (max_len, 1, d_model) -> x + pe[:seq_len]."""
    seq_len, batch, d_model = x.shape
    max_len = pe.shape[0]
    assert pe.shape == (max_len, 1, d_model)
    assert seq_len <= max_len, "sequence longer than the pe buffer"

    if pe.dtype != x.dtype:
        # Fallback only: store pe in the activation dtype at init to avoid this.
        pe = pe.astype(x.dtype)

    itemsize = jnp.dtype(x.dtype).itemsize
    gran = _SUBLANE_GRANULE.get(itemsize, 8)
    vmem_limit, vmem_budget = _vmem_budget()
    x_bytes = x.size * itemsize

    if batch == 1:
        # --- 2-D path: put sequence rows on the sublane axis (full packing). ---
        x2 = x.reshape(seq_len, d_model)                    # free squeeze
        pe2 = pe.reshape(max_len, d_model)                  # free squeeze
        tile_s = _choose_tile_2d(seq_len, d_model, itemsize, vmem_budget)
        tile_s = _cap_for_pipeline(tile_s, seq_len, x_bytes, gran)

        out2 = pl.pallas_call(
            _pe_add_kernel,
            out_shape=jax.ShapeDtypeStruct((seq_len, d_model), x.dtype),
            grid=(pl.cdiv(seq_len, tile_s),),
            in_specs=[
                pl.BlockSpec((tile_s, d_model), lambda i: (i, 0)),
                pl.BlockSpec((tile_s, d_model), lambda i: (i, 0)),
            ],
            out_specs=pl.BlockSpec((tile_s, d_model), lambda i: (i, 0)),
            compiler_params=pltpu.CompilerParams(
                dimension_semantics=("parallel",),
                vmem_limit_bytes=vmem_limit,
            ),
        )(x2, pe2)
        return out2.reshape(seq_len, 1, d_model)

    # --- 3-D path: batch on sublanes, d_model on lanes, pe fetched once per seq tile. ---
    # TODO(synk): for d_model % 128 != 0 with batch >= granule one could flatten
    # (batch, d_model) onto the lane axis for denser stores; not done here.
    tile_s, tile_b = _choose_tiles_3d(seq_len, batch, d_model, itemsize, vmem_budget)
    tile_s = _cap_for_pipeline(tile_s, seq_len, x_bytes, 8)

    grid = (pl.cdiv(seq_len, tile_s), pl.cdiv(batch, tile_b))

    return pl.pallas_call(
        _pe_add_kernel,
        out_shape=jax.ShapeDtypeStruct((seq_len, batch, d_model), x.dtype),
        grid=grid,
        in_specs=[
            pl.BlockSpec((tile_s, tile_b, d_model), lambda i, j: (i, j, 0)),
            pl.BlockSpec((tile_s, 1, d_model), lambda i, j: (i, 0, 0)),
        ],
        out_specs=pl.BlockSpec((tile_s, tile_b, d_model), lambda i, j: (i, j, 0)),
        # NOTE: no input_output_aliases -- without guaranteed donation at the
        # enclosing jit, aliasing forces XLA to insert a defensive copy of x.
        compiler_params=pltpu.CompilerParams(
            dimension_semantics=("parallel", "parallel"),
            vmem_limit_bytes=vmem_limit,
        ),
    )(x, pe)


if __name__ == "__main__":
    seq_len, batch, d_model = 8, 2, 32
    max_len = 1000

    key = jax.random.PRNGKey(0)
    k1, k2 = jax.random.split(key)

    # pe buffer built once, already in the activation dtype (no per-call cast).
    pe = _build_pe(d_model, max_len, dtype=jnp.float32)

    # 3-D path (batch > 1).
    x = jax.random.normal(k1, (seq_len, batch, d_model), dtype=jnp.float32)
    ref = x + pe[:seq_len]
    out = jax.block_until_ready(positional_encoding_forward(x, pe))
    assert out.shape == (seq_len, batch, d_model)
    assert jnp.allclose(out, ref, atol=1e-6), "mismatch vs reference (batch=2 path)"

    # 2-D path (batch == 1, sublane-packed).
    x1 = jax.random.normal(k2, (seq_len, 1, d_model), dtype=jnp.float32)
    ref1 = x1 + pe[:seq_len]
    out1 = jax.block_until_ready(positional_encoding_forward(x1, pe))
    assert out1.shape == (seq_len, 1, d_model)
    assert jnp.allclose(out1, ref1, atol=1e-6), "mismatch vs reference (batch=1 path)"

    print("KERNEL_OK")
</pallas_src>

<mosaic_0001>
module attributes {stable_mosaic.version = 11 : i64} {
  func.func @_pe_add_kernel(%arg0: i32, %arg1: i32, %arg2: memref<8x2x32xf32, #tpu.memory_space<vmem>>, %arg3: memref<8x1x32xf32, #tpu.memory_space<vmem>>, %arg4: memref<8x2x32xf32, #tpu.memory_space<vmem>>) attributes {dimension_semantics = [#tpu.dimension_semantics<parallel>, #tpu.dimension_semantics<parallel>], iteration_bounds = array<i64: 1, 1>, scalar_prefetch = 0 : i64, scratch_operands = 0 : i64, tpu.core_type = #tpu.core_type<tc>, window_params = [{transform_indices = @transform_0, window_bounds = array<i64: 8, 2, 32>}, {transform_indices = @transform_1, window_bounds = array<i64: 8, 1, 32>}, {transform_indices = @transform_2, window_bounds = array<i64: 8, 2, 32>}]} {
    %c0 = arith.constant 0 : index
    %c0_0 = arith.constant 0 : index
    %c0_1 = arith.constant 0 : index
    %0 = vector.load %arg2[%c0, %c0_0, %c0_1] : memref<8x2x32xf32, #tpu.memory_space<vmem>>, vector<8x2x32xf32>
    %c0_2 = arith.constant 0 : index
    %c0_3 = arith.constant 0 : index
    %c0_4 = arith.constant 0 : index
    %1 = vector.load %arg3[%c0_2, %c0_3, %c0_4] : memref<8x1x32xf32, #tpu.memory_space<vmem>>, vector<8x1x32xf32>
    %2 = vector.broadcast %1 : vector<8x1x32xf32> to vector<8x2x32xf32>
    %3 = arith.addf %0, %2 : vector<8x2x32xf32>
    %c0_5 = arith.constant 0 : index
    %c0_6 = arith.constant 0 : index
    %c0_7 = arith.constant 0 : index
    %4 = vector.load %arg4[%c0_5, %c0_6, %c0_7] : memref<8x2x32xf32, #tpu.memory_space<vmem>>, vector<8x2x32xf32>
    tpu.vector_store %arg4[%c0_5, %c0_6, %c0_7], %3 {strides = array<i32>} : memref<8x2x32xf32, #tpu.memory_space<vmem>>, vector<8x2x32xf32>,
    return
  }
  func.func @transform_0(%arg0: i32, %arg1: i32) -> (i32, i32, i32) {
    %c0_i32 = arith.constant 0 : i32
    %c0_i32_0 = arith.constant 0 : i32
    return %arg0, %arg1, %c0_i32 : i32, i32, i32
  }
  func.func @transform_1(%arg0: i32, %arg1: i32) -> (i32, i32, i32) {
    %c0_i32 = arith.constant 0 : i32
    %c0_i32_0 = arith.constant 0 : i32
    %c0_i32_1 = arith.constant 0 : i32
    return %arg0, %c0_i32, %c0_i32_0 : i32, i32, i32
  }
  func.func @transform_2(%arg0: i32, %arg1: i32) -> (i32, i32, i32) {
    %c0_i32 = arith.constant 0 : i32
    %c0_i32_0 = arith.constant 0 : i32
    return %arg0, %arg1, %c0_i32 : i32, i32, i32
  }
}

</mosaic_0001>

<bundles_post_ra>
// kernel: tpu_custom_call.1
= control target key start
LH: loop header
LB: loop body
LE: loop exit
PB: predicated region body
PF: predicated region fallthrough
CT: control target
= control target key end

     0   :  { %vm84_vm0 = vcmask 254976   ;;  %s219_s0 = inlined_call_operand.vmem [shape: f32[8,2,32], index: 0, kind: input, shape index: {}]   ;;  %s220_s1 = inlined_call_operand.vmem [shape: f32[1000,1,32], index: 1, kind: input, shape index: {}]   ;;  %s221_s2 = inlined_call_operand.hbm [shape: f32[8,2,32], index: 2, kind: output, shape index: {}]  }
   0x1   :  { %v12_v0 = vld [vmem:[%s219_s0] sm:$0x3]  ;;  %v13_v3 = vld [vmem:[%s219_s0 + $0x2] sm:$0x3]  ;;  %v14_v5 = vld [vmem:[%s219_s0 + $0x4] sm:$0x3] }
   0x2   :  { %v109_v1 = vld [vmem:[%s220_s1] ss:$0 sm:$0xff]  ;;  %v110_v4 = vld [vmem:[%s220_s1 + $0x1] ss:$0 sm:$0xff]  ;;  %v111_v7 = vld [vmem:[%s220_s1 + $0x2] ss:$0 sm:$0xff] }
   0x3   :  { %v76_v2 = vadd.f32 %v109_v1, %v12_v0  ;;  %v77_v6 = vadd.f32 %v110_v4, %v13_v3  ;;  %v15_v8 = vld [vmem:[%s219_s0 + $0x6] sm:$0x3]  ;;  %v112_v9 = vld [vmem:[%s220_s1 + $0x3] ss:$0 sm:$0xff]  ;;  %v78_v10 = vadd.f32 %v111_v7, %v14_v5  ;;  %v16_v12 = vld [vmem:[%s219_s0 + $0x8] sm:$0x3] }
   0x4   :  { %v79_v11 = vadd.f32 %v112_v9, %v15_v8  ;;  %v113_v13 = vld [vmem:[%s220_s1 + $0x4] ss:$0 sm:$0xff]  ;;  %v17_v14 = vld [vmem:[%s219_s0 + $0xa] sm:$0x3]  ;;  %v114_v16 = vld [vmem:[%s220_s1 + $0x5] ss:$0 sm:$0xff] }
   0x5   :  { %85 = vst.msk [vmem:[#allocation2] sm:$0x3] %vm84_vm0, %v76_v2  ;;  %86 = vst.msk [vmem:[#allocation2 + $0x2] sm:$0x3] %vm84_vm0, %v77_v6  ;;  %v80_v15 = vadd.f32 %v113_v13, %v16_v12  ;;  %v18_v17 = vld [vmem:[%s219_s0 + $0xc] sm:$0x3]  ;;  %v81_v19 = vadd.f32 %v114_v16, %v17_v14 }
   0x6   :  { %v115_v18 = vld [vmem:[%s220_s1 + $0x6] ss:$0 sm:$0xff]  ;;  %87 = vst.msk [vmem:[#allocation2 + $0x4] sm:$0x3] %vm84_vm0, %v78_v10  ;;  %88 = vst.msk [vmem:[#allocation2 + $0x6] sm:$0x3] %vm84_vm0, %v79_v11 }
   0x7   :  { %v82_v20 = vadd.f32 %v115_v18, %v18_v17  ;;  %v19_v21 = vld [vmem:[%s219_s0 + $0xe] sm:$0x3]  ;;  %v116_v22 = vld [vmem:[%s220_s1 + $0x7] ss:$0 sm:$0xff] }
   0x8   :  { %7 = vsyncpa [#allocation3], 0  ;;  %89 = vst.msk [vmem:[#allocation2 + $0x8] sm:$0x3] %vm84_vm0, %v80_v15  ;;  %v83_v23 = vadd.f32 %v116_v22, %v19_v21  ;;  %s142_s13 = smov [#allocation2]  }
   0x9   :  { %s98_s14 = sshll.u32 %s142_s13, 4  ;;  %90 = vst.msk [vmem:[#allocation2 + $0xa] sm:$0x3] %vm84_vm0, %v81_v19  ;;  %91 = vst.msk [vmem:[#allocation2 + $0xc] sm:$0x3] %vm84_vm0, %v82_v20  ;;  %s99_s14 = int_to_ptr.vmem [resolvable:$true] %s98_s14 }
   0xa   :  { %92 = vst.msk [vmem:[#allocation2 + $0xe] sm:$0x3] %vm84_vm0, %v83_v23  ;;  %s120_s15 = scalar_lea.vmem %s99_s14, 256  ;;  %p125_p1 = scmp.lt.s32.totalorder %s99_s14, %s99_s14 }
   0xb   :  { %p121_p0 = scmp.ne.s32.totalorder %s99_s14, %s120_s15  ;;  %p126_p2 = scmp.lt.s32.totalorder %s120_s15, %s120_s15 }
   0xd   :  { %p127_p3 = por %p126_p2, %p125_p1 }
   0xf   :  { %p128_p4 = pnand %p127_p3, %p121_p0 }
  0x11   :  { %131 = shalt.err (!%p128_p4)
}
  0x12   :  { %s143_s0 = smov 32   ;;  %s144_s1 = smov 2  }
  0x13   :  { %104 = dma.vmem_to_hbm [thread:$0]  %s99_s14, 256, %s221_s2, [#allocation3], %s143_s0, %s143_s0, %s144_s1  }
  0x14   :  { %140 = dma.done.wait [#allocation3], 256  }
  0x15   :  { %141 = vsyncadd [#allocation3], 4294967040 }
  0x16   :  { %108 = vsyncpa [#allocation3], 1 }

</bundles_post_ra>
